<compile_context>
chip_gen: v7x
topology: tpu7x:2x2x1
jax: 0.10.0
libtpu: 0.0.40
codegen_flags: <defaults>
</compile_context>

<pallas_src>
import functools

import jax
import jax.numpy as jnp
from jax.experimental import pallas as pl
from jax.experimental.pallas import tpu as pltpu


def _distill_kl_kernel(ys_ref, yt_ref, o_ref, *, inv_T, scale, n_rows, tm,
                       needs_mask):
    i = pl.program_id(0)

    @pl.when(i == 0)
    def _init():
        o_ref[...] = jnp.zeros_like(o_ref)

    # Cast to f32 (required on v5e VPU, cheap elsewhere); multiply by 1/T
    # instead of dividing.
    ys = ys_ref[...].astype(jnp.float32) * inv_T
    yt = yt_ref[...].astype(jnp.float32) * inv_T

    # Student: only the log-sum-exp denominator is needed; the per-element
    # log_softmax subtraction is folded into the per-row correction below.
    ys_sh = ys - jnp.max(ys, axis=1, keepdims=True)
    log_s = jnp.log(jnp.sum(jnp.exp(ys_sh), axis=1, keepdims=True))   # (TM,1)

    # Teacher: exp + row-sum only; softmax normalization and log_p_t are
    # folded into per-row scalars, so no full-tile divide / log temporaries.
    yt_sh = yt - jnp.max(yt, axis=1, keepdims=True)
    yt_exp = jnp.exp(yt_sh)
    denom = jnp.sum(yt_exp, axis=1, keepdims=True)                     # (TM,1)

    # KL per row: sum_c p_t*(log p_t - log p_s)
    #   = (1/denom) * sum_c yt_exp*(yt_sh - ys_sh) + log_s - log(denom)
    # (Also robust: underflowed teacher probs contribute exactly 0, no NaNs.)
    inner = jnp.sum(yt_exp * (yt_sh - ys_sh), axis=1, keepdims=True)
    kl_row = inner * pl.reciprocal(denom, approx=True) + (log_s - jnp.log(denom))

    if needs_mask:
        # Ragged last tile: garbage rows contribute exactly 0.
        row_ids = i * tm + jax.lax.broadcasted_iota(jnp.int32, kl_row.shape, 0)
        kl_row = jnp.where(row_ids < n_rows, kl_row, 0.0)

    # Accumulate into the grid-resident (1,1) output block.
    o_ref[...] += jnp.sum(kl_row, keepdims=True)

    @pl.when(i == pl.num_programs(0) - 1)
    def _finalize():
        o_ref[...] = o_ref[...] * scale


def distill_kl(y_s, y_t, T=0.4, block_rows=None):
    assert y_s.shape == y_t.shape and y_s.ndim == 2
    N, C = y_s.shape
    itemsize = max(jnp.dtype(y_s.dtype).itemsize, jnp.dtype(y_t.dtype).itemsize)

    if block_rows is None:
        # Per-row VMEM cost: 2 inputs x 2 pipeline buffers x C x itemsize
        # plus ~6 live f32 intermediate tiles of width C.  Stay under the
        # smallest default scoped-VMEM limit (16 MiB on v5e).
        per_row_bytes = (4 * itemsize + 24) * C
        budget_bytes = 12 * 1024 * 1024
        tm = budget_bytes // per_row_bytes
        tm = min(tm, 1024)                 # bigger tile amortizes ~0.35us/step
        tm = max(8, (tm // 8) * 8)         # sublane alignment
    else:
        assert block_rows % 8 == 0, "block_rows must be a multiple of 8"
        tm = block_rows
    padded_n = ((N + 7) // 8) * 8
    tm = min(tm, padded_n)

    grid = (pl.cdiv(N, tm),)
    needs_mask = (N % tm) != 0

    inv_T = 1.0 / float(T)
    scale = float(T) * float(T) / (float(N) * float(N))

    kernel = functools.partial(
        _distill_kl_kernel, inv_T=inv_T, scale=scale, n_rows=N, tm=tm,
        needs_mask=needs_mask,
    )

    bytes_accessed = (
        N * C * (jnp.dtype(y_s.dtype).itemsize + jnp.dtype(y_t.dtype).itemsize) + 4
    )

    out = pl.pallas_call(
        kernel,
        out_shape=jax.ShapeDtypeStruct((1, 1), jnp.float32),
        grid=grid,
        in_specs=[
            pl.BlockSpec((tm, C), lambda i: (i, 0)),
            pl.BlockSpec((tm, C), lambda i: (i, 0)),
        ],
        out_specs=pl.BlockSpec((1, 1), lambda i: (0, 0)),
        compiler_params=pltpu.CompilerParams(
            dimension_semantics=("arbitrary",),  # reduction axis: acc resident
        ),
        cost_estimate=pl.CostEstimate(
            flops=8 * N * C,
            transcendentals=2 * N * C,
            bytes_accessed=bytes_accessed,
        ),
    )(y_s, y_t)
    return out[0, 0]


def _distill_kl_ref(y_s, y_t, T=0.4):
    ys = y_s.astype(jnp.float32) / T
    yt = y_t.astype(jnp.float32) / T
    log_p_s = jax.nn.log_softmax(ys, axis=1)
    p_t = jax.nn.softmax(yt, axis=1)
    log_p_t = jax.nn.log_softmax(yt, axis=1)
    n = y_s.shape[0]
    return jnp.sum(p_t * (log_p_t - log_p_s)) / n * (T**2) / n


if __name__ == "__main__":
    key = jax.random.PRNGKey(0)
    k1, k2, k3, k4 = jax.random.split(key, 4)

    # Small shape consistent with the module: batch of 8, 128 classes.
    N, C = 8, 128
    y_s = jax.random.normal(k1, (N, C), dtype=jnp.float32)
    y_t = jax.random.normal(k2, (N, C), dtype=jnp.float32)

    loss = distill_kl(y_s, y_t, T=0.4)
    jax.block_until_ready(loss)
    ref = _distill_kl_ref(y_s, y_t, T=0.4)
    assert jnp.allclose(loss, ref, rtol=2e-3, atol=1e-5), (loss, ref)

    # Exercise the gridded / ragged-tail path: N=20 with 8-row tiles (3 blocks,
    # last block masked).
    N2, C2 = 20, 256
    y_s2 = jax.random.normal(k3, (N2, C2), dtype=jnp.float32)
    y_t2 = jax.random.normal(k4, (N2, C2), dtype=jnp.float32)
    loss2 = distill_kl(y_s2, y_t2, T=0.4, block_rows=8)
    jax.block_until_ready(loss2)
    ref2 = _distill_kl_ref(y_s2, y_t2, T=0.4)
    assert jnp.allclose(loss2, ref2, rtol=2e-3, atol=1e-5), (loss2, ref2)

    print("KERNEL_OK")
</pallas_src>

<mosaic_0001>
module attributes {stable_mosaic.version = 11 : i64} {
  func.func @_distill_kl_kernel(%arg0: i32, %arg1: memref<8x128xf32, #tpu.memory_space<vmem>>, %arg2: memref<8x128xf32, #tpu.memory_space<vmem>>, %arg3: memref<1x1xf32, #tpu.memory_space<vmem>>) attributes {dimension_semantics = [#tpu.dimension_semantics<arbitrary>], iteration_bounds = array<i64: 1>, scalar_prefetch = 0 : i64, scratch_operands = 0 : i64, tpu.core_type = #tpu.core_type<tc>, window_params = [{transform_indices = @transform_0, window_bounds = array<i64: 8, 128>}, {transform_indices = @transform_1, window_bounds = array<i64: 8, 128>}, {pipeline_mode = #tpu.pipeline_mode<synchronous>, transform_indices = @transform_2, window_bounds = array<i64: 1, 1>}]} {
    %c0_i32 = arith.constant 0 : i32
    %0 = arith.cmpi eq, %arg0, %c0_i32 : i32
    %1 = arith.extui %0 : i1 to i32
    %c0_i32_0 = arith.constant 0 : i32
    %2 = arith.cmpi ne, %1, %c0_i32_0 : i32
    scf.if %2 {
      %cst_17 = arith.constant 0.000000e+00 : f32
      %44 = vector.broadcast %cst_17 : f32 to vector<1x1xf32>
      %c0_18 = arith.constant 0 : index
      %c0_19 = arith.constant 0 : index
      %45 = vector.load %arg3[%c0_18, %c0_19] : memref<1x1xf32, #tpu.memory_space<vmem>>, vector<1x1xf32>
      tpu.vector_store %arg3[%c0_18, %c0_19], %44 {strides = array<i32>} : memref<1x1xf32, #tpu.memory_space<vmem>>, vector<1x1xf32>,
    } else {
    }
    %c0 = arith.constant 0 : index
    %c0_1 = arith.constant 0 : index
    %3 = vector.load %arg1[%c0, %c0_1] : memref<8x128xf32, #tpu.memory_space<vmem>>, vector<8x128xf32>
    %cst = arith.constant 2.500000e+00 : f32
    %4 = vector.broadcast %cst : f32 to vector<8x128xf32>
    %5 = arith.mulf %3, %4 : vector<8x128xf32>
    %c0_2 = arith.constant 0 : index
    %c0_3 = arith.constant 0 : index
    %6 = vector.load %arg2[%c0_2, %c0_3] : memref<8x128xf32, #tpu.memory_space<vmem>>, vector<8x128xf32>
    %cst_4 = arith.constant 2.500000e+00 : f32
    %7 = vector.broadcast %cst_4 : f32 to vector<8x128xf32>
    %8 = arith.mulf %6, %7 : vector<8x128xf32>
    %cst_5 = arith.constant dense<0xFF800000> : vector<8xf32>
    %9 = vector.multi_reduction <maximumf>, %5, %cst_5 [1] : vector<8x128xf32> to vector<8xf32>
    %10 = vector.shape_cast %9 : vector<8xf32> to vector<8x1xf32>
    %11 = vector.broadcast %10 : vector<8x1xf32> to vector<8x128xf32>
    %12 = arith.subf %5, %11 : vector<8x128xf32>
    %13 = math.exp %12 : vector<8x128xf32>
    %cst_6 = arith.constant dense<0.000000e+00> : vector<8xf32>
    %14 = vector.multi_reduction <add>, %13, %cst_6 [1] : vector<8x128xf32> to vector<8xf32>
    %15 = vector.shape_cast %14 : vector<8xf32> to vector<8x1xf32>
    %16 = math.log %15 : vector<8x1xf32>
    %cst_7 = arith.constant dense<0xFF800000> : vector<8xf32>
    %17 = vector.multi_reduction <maximumf>, %8, %cst_7 [1] : vector<8x128xf32> to vector<8xf32>
    %18 = vector.shape_cast %17 : vector<8xf32> to vector<8x1xf32>
    %19 = vector.broadcast %18 : vector<8x1xf32> to vector<8x128xf32>
    %20 = arith.subf %8, %19 : vector<8x128xf32>
    %21 = math.exp %20 : vector<8x128xf32>
    %cst_8 = arith.constant dense<0.000000e+00> : vector<8xf32>
    %22 = vector.multi_reduction <add>, %21, %cst_8 [1] : vector<8x128xf32> to vector<8xf32>
    %23 = vector.shape_cast %22 : vector<8xf32> to vector<8x1xf32>
    %24 = arith.subf %20, %12 : vector<8x128xf32>
    %25 = arith.mulf %21, %24 : vector<8x128xf32>
    %cst_9 = arith.constant dense<0.000000e+00> : vector<8xf32>
    %26 = vector.multi_reduction <add>, %25, %cst_9 [1] : vector<8x128xf32> to vector<8xf32>
    %27 = vector.shape_cast %26 : vector<8xf32> to vector<8x1xf32>
    %28 = tpu.reciprocal %23 {approx = true} : vector<8x1xf32> -> vector<8x1xf32>
    %29 = arith.mulf %27, %28 : vector<8x1xf32>
    %30 = math.log %23 : vector<8x1xf32>
    %31 = arith.subf %16, %30 : vector<8x1xf32>
    %32 = arith.addf %29, %31 : vector<8x1xf32>
    %c0_10 = arith.constant 0 : index
    %c0_11 = arith.constant 0 : index
    %33 = vector.load %arg3[%c0_10, %c0_11] : memref<1x1xf32, #tpu.memory_space<vmem>>, vector<1x1xf32>
    %34 = vector.shape_cast %32 : vector<8x1xf32> to vector<1x8x1xf32>
    %cst_12 = arith.constant dense<0.000000e+00> : vector<1xf32>
    %35 = vector.multi_reduction <add>, %34, %cst_12 [1, 2] : vector<1x8x1xf32> to vector<1xf32>
    %36 = vector.shape_cast %35 : vector<1xf32> to vector<1x1x1xf32>
    %37 = vector.extract %36[0, 0, 0] : f32 from vector<1x1x1xf32>
    %38 = vector.broadcast %37 : f32 to vector<1x1xf32>
    %39 = arith.addf %33, %38 : vector<1x1xf32>
    %c0_13 = arith.constant 0 : index
    %c0_14 = arith.constant 0 : index
    %40 = vector.load %arg3[%c0_13, %c0_14] : memref<1x1xf32, #tpu.memory_space<vmem>>, vector<1x1xf32>
    tpu.vector_store %arg3[%c0_13, %c0_14], %39 {strides = array<i32>} : memref<1x1xf32, #tpu.memory_space<vmem>>, vector<1x1xf32>,
    %c0_i32_15 = arith.constant 0 : i32
    %41 = arith.cmpi eq, %arg0, %c0_i32_15 : i32
    %42 = arith.extui %41 : i1 to i32
    %c0_i32_16 = arith.constant 0 : i32
    %43 = arith.cmpi ne, %42, %c0_i32_16 : i32
    scf.if %43 {
      %c0_17 = arith.constant 0 : index
      %c0_18 = arith.constant 0 : index
      %44 = vector.load %arg3[%c0_17, %c0_18] : memref<1x1xf32, #tpu.memory_space<vmem>>, vector<1x1xf32>
      %cst_19 = arith.constant 2.500000e-03 : f32
      %45 = vector.broadcast %cst_19 : f32 to vector<1x1xf32>
      %46 = arith.mulf %44, %45 : vector<1x1xf32>
      %c0_20 = arith.constant 0 : index
      %c0_21 = arith.constant 0 : index
      %47 = vector.load %arg3[%c0_20, %c0_21] : memref<1x1xf32, #tpu.memory_space<vmem>>, vector<1x1xf32>
      tpu.vector_store %arg3[%c0_20, %c0_21], %46 {strides = array<i32>} : memref<1x1xf32, #tpu.memory_space<vmem>>, vector<1x1xf32>,
    } else {
    }
    return
  }
  func.func @transform_0(%arg0: i32) -> (i32, i32) {
    %c0_i32 = arith.constant 0 : i32
    %c0_i32_0 = arith.constant 0 : i32
    return %arg0, %c0_i32 : i32, i32
  }
  func.func @transform_1(%arg0: i32) -> (i32, i32) {
    %c0_i32 = arith.constant 0 : i32
    %c0_i32_0 = arith.constant 0 : i32
    return %arg0, %c0_i32 : i32, i32
  }
  func.func @transform_2(%arg0: i32) -> (i32, i32) {
    %c0_i32 = arith.constant 0 : i32
    %c0_i32_0 = arith.constant 0 : i32
    %c0_i32_1 = arith.constant 0 : i32
    return %c0_i32, %c0_i32_0 : i32, i32
  }
}

</mosaic_0001>

<bundles_post_ra>
// kernel: tpu_custom_call.1
= control target key start
LH: loop header
LB: loop body
LE: loop exit
PB: predicated region body
PF: predicated region fallthrough
CT: control target
= control target key end

     0   :  { %7 = vsyncpa [#allocation3], 0  ;;  %s256_s0 = inlined_call_operand.hbm [shape: f32[8,128], index: 0, kind: input, shape index: {}]   ;;  %s257_s1 = inlined_call_operand.hbm [shape: f32[8,128], index: 1, kind: input, shape index: {}]   ;;  %s258_s2 = inlined_call_operand.hbm [shape: f32[1,1], index: 2, kind: output, shape index: {}]  }
   0x1   :  { %8 = vsyncpa [#allocation6], 0 }
   0x2   :  { %9 = vsyncpa [#allocation4], 0  ;;  %s198_s9 = smov [#allocation2]   ;;  %s199_s11 = smov [#allocation5]  }
   0x3   :  { %s16_s10 = sshll.u32 %s198_s9, 4  ;;  %s26_s12 = sshll.u32 %s199_s11, 4  ;;  %s17_s10 = int_to_ptr.vmem [resolvable:$true] %s16_s10  ;;  %s27_s12 = int_to_ptr.vmem [resolvable:$true] %s26_s12 }
   0x4   :  { %s126_s15 = scalar_lea.hbm %s256_s0, 128 }
   0x5   :  { %p127_p0 = scmp.ne.s32.totalorder %s256_s0, %s126_s15  ;;  %p130_p1 = scmp.lt.u32.totalorder %s126_s15, %s256_s0 }
   0x7   :  { %p132_p2 = pnand %p130_p1, %p127_p0 }
   0x9   :  { %135 = shalt.err (!%p132_p2)
}
   0xa   :  { %s136_s20 = scalar_lea.vmem %s17_s10, 128  ;;  %p141_p4 = scmp.lt.s32.totalorder %s17_s10, %s17_s10 }
   0xb   :  { %p137_p3 = scmp.ne.s32.totalorder %s17_s10, %s136_s20  ;;  %p142_p5 = scmp.lt.s32.totalorder %s136_s20, %s136_s20 }
   0xd   :  { %p143_p6 = por %p142_p5, %p141_p4 }
   0xf   :  { %p144_p7 = pnand %p143_p6, %p137_p3 }
  0x11   :  { %147 = shalt.err (!%p144_p7)
}
  0x12   :  { %19 = dma.hbm_to_vmem [thread:$0]  %s256_s0, 128, %s17_s10, [#allocation3]  }
  0x13   :  { %s148_s25 = scalar_lea.hbm %s257_s1, 128 }
  0x14   :  { %p149_p8 = scmp.ne.s32.totalorder %s257_s1, %s148_s25  ;;  %p152_p9 = scmp.lt.u32.totalorder %s148_s25, %s257_s1 }
  0x16   :  { %p154_p10 = pnand %p152_p9, %p149_p8 }
  0x18   :  { %157 = shalt.err (!%p154_p10)
}
  0x19   :  { %s158_s30 = scalar_lea.vmem %s27_s12, 128  ;;  %p163_p12 = scmp.lt.s32.totalorder %s27_s12, %s27_s12 }
  0x1a   :  { %p159_p11 = scmp.ne.s32.totalorder %s27_s12, %s158_s30  ;;  %p164_p13 = scmp.lt.s32.totalorder %s158_s30, %s158_s30 }
  0x1c   :  { %p165_p0 = por %p164_p13, %p163_p12 }
  0x1e   :  { %p166_p1 = pnand %p165_p0, %p159_p11 }
  0x20   :  { %169 = shalt.err (!%p166_p1)
}
  0x21   :  { %29 = dma.hbm_to_vmem [thread:$0]  %s257_s1, 128, %s27_s12, [#allocation6]  }
  0x22   :  { %192 = dma.done.wait [#allocation3], 128  }
  0x23   :  { %193 = vsyncadd [#allocation3], 4294967168 }
  0x24   :  { %194 = dma.done.wait [#allocation6], 128  }
  0x25   :  { %195 = vsyncadd [#allocation6], 4294967168  ;;  %v42_v0 = vld [vmem:[#allocation2] sm:$0xff]  ;;  %v44_v1 = vld [vmem:[#allocation5] sm:$0xff]  ;;  %vm73_vm0 = vcmask 7168   ;;  %vm40_vm1 = vcmask 0  }
  0x26   :  { %v43_v2 = vmul.f32 2.5, %v42_v0  ;;  %v45_v3 = vmul.f32 2.5, %v44_v1  ;;  %v200_v26 = vmov 0.0   ;;  %s201_s4 = smov [#allocation7]  }
  0x27   :  { %41 = vst.msk [vmem:[#allocation7] sm:$0x1] %vm40_vm1, %v200_v26  ;;  %s100_s5 = sshll.u32 %s201_s4, 4  ;;  %s101_s5 = int_to_ptr.vmem [resolvable:$true] %s100_s5 }
  0x28   :  { %46 = vmax.xlane.f32.xlu0 %v43_v2  ;;  %s170_s6 = scalar_lea.vmem %s101_s5, 16  ;;  %s174_s7 = scalar_lea.vmem %s101_s5, 32 }
  0x29   :  { %p171_p2 = scmp.ne.s32.totalorder %s101_s5, %s170_s6  ;;  %p175_p3 = scmp.lt.s32.totalorder %s101_s5, %s101_s5 }
  0x2a   :  { %p176_p4 = scmp.lt.s32.totalorder %s174_s7, %s170_s6 }
  0x2c   :  { %55 = vmax.xlane.f32.xlu0 %v45_v3  ;;  %p177_p5 = por %p176_p4, %p175_p3 }
  0x2e   :  { %v72_v34 = vld [vmem:[#allocation7] sm:$0x1]  ;;  %p178_p6 = pnand %p177_p5, %p171_p2 }
  0xb5   :  { %v47_v4 = vpop.xlane.xlu0 %46 }
  0xb6   :  { %v48_v5 = vsub.f32 %v43_v2, %v47_v4 }
  0xb8   :  { %v49_v6 = vmul.f32 1.442695, %v48_v5 }
  0xb9   :  { %v56_v7 = vpop.xlane.xlu0 %55 }
  0xba   :  { %v57_v8 = vsub.f32 %v45_v3, %v56_v7  ;;  %116 = vpow2.f32 %v49_v6 }
  0xbc   :  { %v58_v9 = vmul.f32 1.442695, %v57_v8  ;;  %v62_v11 = vsub.f32 %v57_v8, %v48_v5 }
  0xbe   :  { %118 = vpow2.f32 %v58_v9 }
  0xc4   :  { %v117_v10 = vpop.eup %116 }
  0xc5   :  { %51 = vadd.xlane.f32.xlu1 %v117_v10 }
  0xc8   :  { %v119_v12 = vpop.eup %118 }
  0xc9   :  { %60 = vadd.xlane.f32.xlu1 %v119_v12  ;;  %v63_v13 = vmul.f32 %v119_v12, %v62_v11 }
  0xcb   :  { %64 = vadd.xlane.f32.xlu0 %v63_v13 }
 0x152   :  { %v52_v14 = vpop.xlane.xlu1 %51 }
 0x153   :  { %120 = vlog2.f32 %v52_v14 }
 0x156   :  { %v61_v15 = vpop.xlane.xlu1 %60 }
 0x157   :  { %122 = vrcp.f32 %v61_v15 }
 0x158   :  { %124 = vlog2.f32 %v61_v15  ;;  %v65_v21 = vpop.xlane.xlu0 %64 }
 0x15d   :  { %v121_v16 = vpop.eup %120 }
 0x15e   :  { %v54_v19 = vmul.f32 0.6931472, %v121_v16 }
 0x161   :  { %v123_v17 = vpop.eup %122 }
 0x162   :  { %v125_v18 = vpop.eup %124  ;;  %v67_v22 = vmul.f32 %v123_v17, %v65_v21 }
 0x163   :  { %v69_v20 = vmul.f32 0.6931472, %v125_v18 }
 0x165   :  { %v70_v23 = vsub.f32 %v54_v19, %v69_v20 }
 0x167   :  { %v71_v24 = vadd.f32 %v70_v23, %v67_v22 }
 0x169   :  { %v74_v25 = vsel %vm73_vm0, %v71_v24, 0.0 }
 0x16a   :  { %75 = vadd.xlane.f32.xlu1 %v74_v25 }
 0x1f7   :  { %v76_v27 = vpop.xlane.xlu1 %75 }
 0x1f8   :  { %v77_v28 = vrot.slane %v76_v27, 4 }
 0x1fa   :  { %v78_v29 = vadd.f32 %v77_v28, %v76_v27 }
 0x1fc   :  { %v79_v30 = vrot.slane %v78_v29, 2 }
 0x1fe   :  { %v80_v31 = vadd.f32 %v79_v30, %v78_v29 }
 0x200   :  { %v81_v32 = vrot.slane %v80_v31, 1 }
 0x202   :  { %v82_v33 = vadd.f32 %v81_v32, %v80_v31 }
 0x204   :  { %110 = vpush %v82_v33 }
 0x235   :  { %s111_s1 = spop %110 }
 0x236   :  { %v84_v35 = vstv %s111_s1 }
 0x237   :  { %v85_v36 = vadd.f32 %v84_v35, %v72_v34 }
 0x239   :  { %87 = vst.msk [vmem:[#allocation7] sm:$0x1] %vm40_vm1, %v85_v36 }
 0x240   :  { %v91_v37 = vld [vmem:[#allocation7] sm:$0x1] }
 0x241   :  { %v92_v38 = vmul.f32 0.0025, %v91_v37 }
 0x243   :  { %93 = vst.msk [vmem:[#allocation7] sm:$0x1] %vm40_vm1, %v92_v38 }
 0x244   :  { %181 = shalt.err (!%p178_p6)
}
 0x245   :  { %s182_s10 = scalar_lea.hbm %s258_s2, 16 }
 0x246   :  { %p183_p7 = scmp.ne.s32.totalorder %s258_s2, %s182_s10  ;;  %p186_p8 = scmp.lt.u32.totalorder %s182_s10, %s258_s2 }
 0x248   :  { %p188_p9 = pnand %p186_p8, %p183_p7 }
 0x24a   :  { %191 = shalt.err (!%p188_p9)
}
 0x24b   :  { %103 = dma.vmem_to_hbm [thread:$0]  %s101_s5, 16, %s258_s2, [#allocation4]  }
 0x24c   :  { %196 = dma.done.wait [#allocation4], 16  }
 0x24d   :  { %197 = vsyncadd [#allocation4], 4294967280 }
 0x24e   :  { %107 = vsyncpa [#allocation3], 1 }
 0x24f   :  { %108 = vsyncpa [#allocation6], 1 }
 0x250   :  { %109 = vsyncpa [#allocation4], 1 }

</bundles_post_ra>
